<compile_context>
chip_gen: v5e
topology: v5e:2x2
jax: 0.10.0
libtpu: 0.0.40
codegen_flags: <defaults>
</compile_context>

<pallas_src>
import functools

import jax
import jax.numpy as jnp
from jax.experimental import pallas as pl
from jax.experimental.pallas import tpu as pltpu


def _cdiv(a, b):
    return (a + b - 1) // b


def _round_up(x, m):
    return ((x + m - 1) // m) * m


def _ce_rowwise(logits_f32, labels_col, valid_col):
    """Per-row (logsumexp - picked_logit), zeroed for invalid rows.

    logits_f32: (R, C) f32; labels_col: (R, 1) i32; valid_col: (R, 1) bool.
    Returns (R, 1) f32 (NOT summed, NOT divided by the batch size).
    """
    R, C = logits_f32.shape
    m = jnp.max(logits_f32, axis=-1, keepdims=True)                      # (R,1)
    lse = m + jnp.log(jnp.sum(jnp.exp(logits_f32 - m), axis=-1, keepdims=True))
    class_ids = jax.lax.broadcasted_iota(jnp.int32, (R, C), 1)           # (R,C)
    picked = jnp.sum(jnp.where(class_ids == labels_col, logits_f32, 0.0),
                     axis=-1, keepdims=True)                             # (R,1)
    # TODO(synk): no ignore_index / -100 handling (original module never uses it).
    return jnp.where(valid_col, lse - picked, 0.0)


def jigen_loss_kernel(preds_ref, labels_ref, jfeat_ref, jlab_ref, w_ref, b_ref,
                      out_ref, acc_img_ref, acc_jig_ref,
                      *, n_img, n_jig, tiles_per_core, matmul_dtype):
    c = pl.program_id(0)            # core-split axis ("parallel")
    i = pl.program_id(1)            # batch-tile axis ("arbitrary", reduction)
    step = c * tiles_per_core + i   # global batch-tile index

    # -- per-core init of the running per-row sums -------------------------
    @pl.when(i == 0)
    def _():
        acc_img_ref[...] = jnp.zeros_like(acc_img_ref)
        acc_jig_ref[...] = jnp.zeros_like(acc_jig_ref)

    # -- image classification cross-entropy (VPU-accumulated per-row) ------
    tb = preds_ref.shape[0]
    row_ids = step * tb + jax.lax.broadcasted_iota(jnp.int32, (tb, 1), 0)
    acc_img_ref[...] += _ce_rowwise(preds_ref[...].astype(jnp.float32),
                                    labels_ref[...], row_ids < n_img)

    # -- jigsaw classifier (Linear, weight kept in (K, D) layout) + CE ------
    x = jfeat_ref[...]
    w = w_ref[...]
    if matmul_dtype is not None:
        x = x.astype(matmul_dtype)
        w = w.astype(matmul_dtype)
    # Contract dim 1 of j_features with dim 1 of the (K, D) weight on the MXU.
    j_logits = jax.lax.dot_general(
        x, w, dimension_numbers=(((1,), (1,)), ((), ())),
        preferred_element_type=jnp.float32) + b_ref[...].astype(jnp.float32)
    tbj = jfeat_ref.shape[0]
    jrow_ids = step * tbj + jax.lax.broadcasted_iota(jnp.int32, (tbj, 1), 0)
    acc_jig_ref[...] += _ce_rowwise(j_logits, jlab_ref[...], jrow_ids < n_jig)

    # -- finalize: one reduce per core, lane-dense (1,1,128) output row -----
    @pl.when(i == tiles_per_core - 1)
    def _():
        img_sum = jnp.sum(acc_img_ref[...])
        jig_sum = jnp.sum(acc_jig_ref[...])
        lane = jax.lax.broadcasted_iota(jnp.int32, out_ref.shape, 2)
        out_ref[...] = jnp.where(lane == 0, img_sum,
                                 jnp.where(lane == 1, jig_sum, 0.0))


@functools.partial(jax.jit, static_argnames=("block_rows", "matmul_dtype"))
def jigen_loss(preds, labels, j_features, j_labels, j_weight, j_bias, weight,
               *, block_rows=512, matmul_dtype=None):
    """Returns (image_loss, jigsaw_loss, total_loss) f32 scalars."""
    B, C = preds.shape
    Bj, D = j_features.shape
    K = j_weight.shape[0]

    def plan(rows):
        tb0 = min(_round_up(B, 8), rows)
        tbj0 = min(_round_up(Bj, 8), rows)
        num_tiles = max(_cdiv(B, tb0), _cdiv(Bj, tbj0))
        splits = 2 if num_tiles >= 2 else 1      # v7x: one half per TensorCore
        tpc = _cdiv(num_tiles, splits)
        total = splits * tpc
        tb = _round_up(_cdiv(B, total), 8)
        tbj = _round_up(_cdiv(Bj, total), 8)
        est = (2 * (tb * (C * preds.dtype.itemsize + 4)
                    + tbj * (D * j_features.dtype.itemsize + 4))
               + 2 * (K * D * j_weight.dtype.itemsize + K * 4)
               + (tb + tbj) * 128 * 4 + splits * 2 * 128 * 4)
        return tb, tbj, splits, tpc, est

    rows = max(8, int(block_rows))
    tb, tbj, splits, tpc, est = plan(rows)
    while est > (48 << 20) and rows > 8:        # keep comfortably inside VMEM
        rows = max(8, rows // 2)
        tb, tbj, splits, tpc, est = plan(rows)

    nblk_img = _cdiv(B, tb)
    nblk_jig = _cdiv(Bj, tbj)

    # Pure metadata reshapes (no HBM copies).
    labels2 = labels.astype(jnp.int32).reshape(B, 1)
    jlab2 = j_labels.astype(jnp.int32).reshape(Bj, 1)
    bias2 = j_bias.reshape(1, K)

    # Clamp fully out-of-range tiles onto the last valid block; the in-kernel
    # row-validity mask zeroes their contribution (same block index -> Pallas
    # does not re-DMA it).
    def img_map(c, i):
        return (jnp.minimum(c * tpc + i, nblk_img - 1), 0)

    def jig_map(c, i):
        return (jnp.minimum(c * tpc + i, nblk_jig - 1), 0)

    in_specs = [
        pl.BlockSpec((tb, C), img_map),              # preds
        pl.BlockSpec((tb, 1), img_map),              # labels
        pl.BlockSpec((tbj, D), jig_map),             # j_features
        pl.BlockSpec((tbj, 1), jig_map),             # j_labels
        pl.BlockSpec((K, D), lambda c, i: (0, 0)),   # j_weight (K, D), as-is
        pl.BlockSpec((1, K), lambda c, i: (0, 0)),   # j_bias
    ]
    out_specs = pl.BlockSpec((1, 1, 128), lambda c, i: (c, 0, 0))

    kernel = functools.partial(
        jigen_loss_kernel, n_img=B, n_jig=Bj, tiles_per_core=tpc,
        matmul_dtype=matmul_dtype)

    cost = pl.CostEstimate(
        flops=2 * Bj * D * K + 8 * (B * C + Bj * K),
        transcendentals=B * C + Bj * K + B + Bj,
        bytes_accessed=(preds.size * preds.dtype.itemsize
                        + j_features.size * j_features.dtype.itemsize
                        + (B + Bj) * 4
                        + K * D * j_weight.dtype.itemsize + K * 4
                        + splits * 128 * 4))

    partial_sums = pl.pallas_call(
        kernel,
        out_shape=jax.ShapeDtypeStruct((splits, 1, 128), jnp.float32),
        grid=(splits, tpc),
        in_specs=in_specs,
        out_specs=out_specs,
        scratch_shapes=[pltpu.VMEM((tb, 1), jnp.float32),
                        pltpu.VMEM((tbj, 1), jnp.float32)],
        compiler_params=pltpu.CompilerParams(
            dimension_semantics=("parallel", "arbitrary"),
            vmem_limit_bytes=int(min(64 << 20, max(2 * est, 32 << 20)))),
        cost_estimate=cost,
    )(preds, labels2, j_features, jlab2, j_weight, bias2)

    image_loss = jnp.sum(partial_sums[:, 0, 0]) / jnp.float32(B)
    jigsaw_loss = jnp.sum(partial_sums[:, 0, 1]) / jnp.float32(Bj)
    total_loss = image_loss + jnp.asarray(weight, jnp.float32) * jigsaw_loss
    return image_loss, jigsaw_loss, total_loss


if __name__ == "__main__":
    def ce_ref(logits, lab):
        logp = jax.nn.log_softmax(logits, axis=-1)
        return -jnp.mean(jnp.take_along_axis(logp, lab[:, None], axis=-1))

    def check(key, B, C, Bj, D, K, weight, **kw):
        k1, k2, k3, k4, k5, k6 = jax.random.split(key, 6)
        preds = jax.random.normal(k1, (B, C), dtype=jnp.float32)
        labels = jax.random.randint(k2, (B,), 0, C, dtype=jnp.int32)
        j_features = jax.random.normal(k3, (Bj, D), dtype=jnp.float32)
        j_labels = jax.random.randint(k4, (Bj,), 0, K, dtype=jnp.int32)
        # deterministic synthetic jigsaw classifier (nn.Linear(D, K)) parameters
        j_weight = 0.1 * jax.random.normal(k5, (K, D), dtype=jnp.float32)
        j_bias = 0.01 * jax.random.normal(k6, (K,), dtype=jnp.float32)

        out = jigen_loss(preds, labels, j_features, j_labels,
                         j_weight, j_bias, weight, **kw)
        image_loss, jigsaw_loss, total_loss = jax.block_until_ready(out)

        # pure-JAX reference
        il_ref = ce_ref(preds, labels)
        jl_ref = ce_ref(j_features @ j_weight.T + j_bias, j_labels)
        tl_ref = il_ref + weight * jl_ref
        assert jnp.allclose(image_loss, il_ref, atol=1e-5), (image_loss, il_ref)
        assert jnp.allclose(jigsaw_loss, jl_ref, atol=1e-5), (jigsaw_loss, jl_ref)
        assert jnp.allclose(total_loss, tl_ref, atol=1e-5), (total_loss, tl_ref)

    key = jax.random.PRNGKey(0)
    k_a, k_b = jax.random.split(key)

    # 1) Small canonical shapes (single tile, single core-split).
    check(k_a, B=8, C=16, Bj=8, D=32, K=31, weight=0.7)
    # 2) Ragged last block + clamped OOB tiles + 2-way core-split path.
    check(k_b, B=20, C=7, Bj=40, D=24, K=11, weight=0.3, block_rows=8)

    print("KERNEL_OK")
</pallas_src>

<mosaic_0001>
module attributes {stable_mosaic.version = 11 : i64} {
  func.func @jigen_loss_kernel(%arg0: i32, %arg1: i32, %arg2: memref<8x16xf32, #tpu.memory_space<vmem>>, %arg3: memref<8x1xi32, #tpu.memory_space<vmem>>, %arg4: memref<8x32xf32, #tpu.memory_space<vmem>>, %arg5: memref<8x1xi32, #tpu.memory_space<vmem>>, %arg6: memref<31x32xf32, #tpu.memory_space<vmem>>, %arg7: memref<1x31xf32, #tpu.memory_space<vmem>>, %arg8: memref<1x1x128xf32, #tpu.memory_space<vmem>>, %arg9: memref<8x1xf32, #tpu.memory_space<vmem>>, %arg10: memref<8x1xf32, #tpu.memory_space<vmem>>) attributes {dimension_semantics = [#tpu.dimension_semantics<parallel>, #tpu.dimension_semantics<arbitrary>], iteration_bounds = array<i64: 1, 1>, scalar_prefetch = 0 : i64, scratch_operands = 2 : i64, tpu.core_type = #tpu.core_type<tc>, window_params = [{transform_indices = @transform_0, window_bounds = array<i64: 8, 16>}, {transform_indices = @transform_1, window_bounds = array<i64: 8, 1>}, {transform_indices = @transform_2, window_bounds = array<i64: 8, 32>}, {transform_indices = @transform_3, window_bounds = array<i64: 8, 1>}, {pipeline_mode = #tpu.pipeline_mode<synchronous>, transform_indices = @transform_4, window_bounds = array<i64: 31, 32>}, {pipeline_mode = #tpu.pipeline_mode<synchronous>, transform_indices = @transform_5, window_bounds = array<i64: 1, 31>}, {transform_indices = @transform_6, window_bounds = array<i64: 1, 1, 128>}]} {
    %c1_i32 = arith.constant 1 : i32
    %0 = arith.muli %arg0, %c1_i32 : i32
    %1 = arith.addi %0, %arg1 : i32
    %c0_i32 = arith.constant 0 : i32
    %2 = arith.cmpi eq, %arg1, %c0_i32 : i32
    %3 = arith.extui %2 : i1 to i32
    %c0_i32_0 = arith.constant 0 : i32
    %4 = arith.cmpi ne, %3, %c0_i32_0 : i32
    scf.if %4 {
      %cst_35 = arith.constant 0.000000e+00 : f32
      %73 = vector.broadcast %cst_35 : f32 to vector<8x1xf32>
      %c0_36 = arith.constant 0 : index
      %c0_37 = arith.constant 0 : index
      %74 = vector.load %arg9[%c0_36, %c0_37] : memref<8x1xf32, #tpu.memory_space<vmem>>, vector<8x1xf32>
      tpu.vector_store %arg9[%c0_36, %c0_37], %73 {strides = array<i32>} : memref<8x1xf32, #tpu.memory_space<vmem>>, vector<8x1xf32>,
      %cst_38 = arith.constant 0.000000e+00 : f32
      %75 = vector.broadcast %cst_38 : f32 to vector<8x1xf32>
      %c0_39 = arith.constant 0 : index
      %c0_40 = arith.constant 0 : index
      %76 = vector.load %arg10[%c0_39, %c0_40] : memref<8x1xf32, #tpu.memory_space<vmem>>, vector<8x1xf32>
      tpu.vector_store %arg10[%c0_39, %c0_40], %75 {strides = array<i32>} : memref<8x1xf32, #tpu.memory_space<vmem>>, vector<8x1xf32>,
    } else {
    }
    %c8_i32 = arith.constant 8 : i32
    %5 = arith.muli %1, %c8_i32 : i32
    %6 = tpu.iota {dimensions = array<i32: 0>} : vector<8x1xi32>
    %7 = vector.broadcast %5 : i32 to vector<8x1xi32>
    %8 = arith.addi %7, %6 : vector<8x1xi32>
    %c0 = arith.constant 0 : index
    %c0_1 = arith.constant 0 : index
    %9 = vector.load %arg9[%c0, %c0_1] : memref<8x1xf32, #tpu.memory_space<vmem>>, vector<8x1xf32>
    %c0_2 = arith.constant 0 : index
    %c0_3 = arith.constant 0 : index
    %10 = vector.load %arg2[%c0_2, %c0_3] : memref<8x16xf32, #tpu.memory_space<vmem>>, vector<8x16xf32>
    %c0_4 = arith.constant 0 : index
    %c0_5 = arith.constant 0 : index
    %11 = vector.load %arg3[%c0_4, %c0_5] : memref<8x1xi32, #tpu.memory_space<vmem>>, vector<8x1xi32>
    %c8_i32_6 = arith.constant 8 : i32
    %12 = vector.broadcast %c8_i32_6 : i32 to vector<8x1xi32>
    %13 = arith.cmpi slt, %8, %12 : vector<8x1xi32>
    %cst = arith.constant dense<0xFF800000> : vector<8xf32>
    %14 = vector.multi_reduction <maximumf>, %10, %cst [1] : vector<8x16xf32> to vector<8xf32>
    %15 = vector.shape_cast %14 : vector<8xf32> to vector<8x1xf32>
    %16 = vector.broadcast %15 : vector<8x1xf32> to vector<8x16xf32>
    %17 = arith.subf %10, %16 : vector<8x16xf32>
    %18 = math.exp %17 : vector<8x16xf32>
    %cst_7 = arith.constant dense<0.000000e+00> : vector<8xf32>
    %19 = vector.multi_reduction <add>, %18, %cst_7 [1] : vector<8x16xf32> to vector<8xf32>
    %20 = vector.shape_cast %19 : vector<8xf32> to vector<8x1xf32>
    %21 = math.log %20 : vector<8x1xf32>
    %22 = arith.addf %15, %21 : vector<8x1xf32>
    %23 = tpu.iota {dimensions = array<i32: 1>} : vector<8x16xi32>
    %24 = vector.broadcast %11 : vector<8x1xi32> to vector<8x16xi32>
    %25 = arith.cmpi eq, %23, %24 : vector<8x16xi32>
    %cst_8 = arith.constant 0.000000e+00 : f32
    %26 = vector.broadcast %cst_8 : f32 to vector<8x16xf32>
    %27 = arith.select %25, %10, %26 : vector<8x16xi1>, vector<8x16xf32>
    %cst_9 = arith.constant dense<0.000000e+00> : vector<8xf32>
    %28 = vector.multi_reduction <add>, %27, %cst_9 [1] : vector<8x16xf32> to vector<8xf32>
    %29 = vector.shape_cast %28 : vector<8xf32> to vector<8x1xf32>
    %30 = arith.subf %22, %29 : vector<8x1xf32>
    %cst_10 = arith.constant 0.000000e+00 : f32
    %31 = vector.broadcast %cst_10 : f32 to vector<8x1xf32>
    %32 = arith.select %13, %30, %31 : vector<8x1xi1>, vector<8x1xf32>
    %33 = arith.addf %9, %32 : vector<8x1xf32>
    %c0_11 = arith.constant 0 : index
    %c0_12 = arith.constant 0 : index
    %34 = vector.load %arg9[%c0_11, %c0_12] : memref<8x1xf32, #tpu.memory_space<vmem>>, vector<8x1xf32>
    tpu.vector_store %arg9[%c0_11, %c0_12], %33 {strides = array<i32>} : memref<8x1xf32, #tpu.memory_space<vmem>>, vector<8x1xf32>,
    %c0_13 = arith.constant 0 : index
    %c0_14 = arith.constant 0 : index
    %35 = vector.load %arg4[%c0_13, %c0_14] : memref<8x32xf32, #tpu.memory_space<vmem>>, vector<8x32xf32>
    %c0_15 = arith.constant 0 : index
    %c0_16 = arith.constant 0 : index
    %36 = vector.load %arg6[%c0_15, %c0_16] : memref<31x32xf32, #tpu.memory_space<vmem>>, vector<31x32xf32>
    %cst_17 = arith.constant dense<0.000000e+00> : vector<8x31xf32>
    %37 = tpu.matmul %35, %36, %cst_17 {dimension_numbers = #tpu.dot_dimension_numbers<[1], [1], [0], [0], [0, 0, 1, 0], [], []>} : vector<8x32xf32>, vector<31x32xf32>, vector<8x31xf32> -> vector<8x31xf32>
    %c0_18 = arith.constant 0 : index
    %c0_19 = arith.constant 0 : index
    %38 = vector.load %arg7[%c0_18, %c0_19] : memref<1x31xf32, #tpu.memory_space<vmem>>, vector<1x31xf32>
    %39 = vector.broadcast %38 : vector<1x31xf32> to vector<8x31xf32>
    %40 = arith.addf %37, %39 : vector<8x31xf32>
    %c8_i32_20 = arith.constant 8 : i32
    %41 = arith.muli %1, %c8_i32_20 : i32
    %42 = tpu.iota {dimensions = array<i32: 0>} : vector<8x1xi32>
    %43 = vector.broadcast %41 : i32 to vector<8x1xi32>
    %44 = arith.addi %43, %42 : vector<8x1xi32>
    %c0_21 = arith.constant 0 : index
    %c0_22 = arith.constant 0 : index
    %45 = vector.load %arg10[%c0_21, %c0_22] : memref<8x1xf32, #tpu.memory_space<vmem>>, vector<8x1xf32>
    %c0_23 = arith.constant 0 : index
    %c0_24 = arith.constant 0 : index
    %46 = vector.load %arg5[%c0_23, %c0_24] : memref<8x1xi32, #tpu.memory_space<vmem>>, vector<8x1xi32>
    %c8_i32_25 = arith.constant 8 : i32
    %47 = vector.broadcast %c8_i32_25 : i32 to vector<8x1xi32>
    %48 = arith.cmpi slt, %44, %47 : vector<8x1xi32>
    %cst_26 = arith.constant dense<0xFF800000> : vector<8xf32>
    %49 = vector.multi_reduction <maximumf>, %40, %cst_26 [1] : vector<8x31xf32> to vector<8xf32>
    %50 = vector.shape_cast %49 : vector<8xf32> to vector<8x1xf32>
    %51 = vector.broadcast %50 : vector<8x1xf32> to vector<8x31xf32>
    %52 = arith.subf %40, %51 : vector<8x31xf32>
    %53 = math.exp %52 : vector<8x31xf32>
    %cst_27 = arith.constant dense<0.000000e+00> : vector<8xf32>
    %54 = vector.multi_reduction <add>, %53, %cst_27 [1] : vector<8x31xf32> to vector<8xf32>
    %55 = vector.shape_cast %54 : vector<8xf32> to vector<8x1xf32>
    %56 = math.log %55 : vector<8x1xf32>
    %57 = arith.addf %50, %56 : vector<8x1xf32>
    %58 = tpu.iota {dimensions = array<i32: 1>} : vector<8x31xi32>
    %59 = vector.broadcast %46 : vector<8x1xi32> to vector<8x31xi32>
    %60 = arith.cmpi eq, %58, %59 : vector<8x31xi32>
    %cst_28 = arith.constant 0.000000e+00 : f32
    %61 = vector.broadcast %cst_28 : f32 to vector<8x31xf32>
    %62 = arith.select %60, %40, %61 : vector<8x31xi1>, vector<8x31xf32>
    %cst_29 = arith.constant dense<0.000000e+00> : vector<8xf32>
    %63 = vector.multi_reduction <add>, %62, %cst_29 [1] : vector<8x31xf32> to vector<8xf32>
    %64 = vector.shape_cast %63 : vector<8xf32> to vector<8x1xf32>
    %65 = arith.subf %57, %64 : vector<8x1xf32>
    %cst_30 = arith.constant 0.000000e+00 : f32
    %66 = vector.broadcast %cst_30 : f32 to vector<8x1xf32>
    %67 = arith.select %48, %65, %66 : vector<8x1xi1>, vector<8x1xf32>
    %68 = arith.addf %45, %67 : vector<8x1xf32>
    %c0_31 = arith.constant 0 : index
    %c0_32 = arith.constant 0 : index
    %69 = vector.load %arg10[%c0_31, %c0_32] : memref<8x1xf32, #tpu.memory_space<vmem>>, vector<8x1xf32>
    tpu.vector_store %arg10[%c0_31, %c0_32], %68 {strides = array<i32>} : memref<8x1xf32, #tpu.memory_space<vmem>>, vector<8x1xf32>,
    %c0_i32_33 = arith.constant 0 : i32
    %70 = arith.cmpi eq, %arg1, %c0_i32_33 : i32
    %71 = arith.extui %70 : i1 to i32
    %c0_i32_34 = arith.constant 0 : i32
    %72 = arith.cmpi ne, %71, %c0_i32_34 : i32
    scf.if %72 {
      %c0_35 = arith.constant 0 : index
      %c0_36 = arith.constant 0 : index
      %73 = vector.load %arg9[%c0_35, %c0_36] : memref<8x1xf32, #tpu.memory_space<vmem>>, vector<8x1xf32>
      %74 = vector.shape_cast %73 : vector<8x1xf32> to vector<1x8x1xf32>
      %cst_37 = arith.constant dense<0.000000e+00> : vector<1xf32>
      %75 = vector.multi_reduction <add>, %74, %cst_37 [1, 2] : vector<1x8x1xf32> to vector<1xf32>
      %76 = vector.shape_cast %75 : vector<1xf32> to vector<1x1x1xf32>
      %77 = vector.extract %76[0, 0, 0] : f32 from vector<1x1x1xf32>
      %c0_38 = arith.constant 0 : index
      %c0_39 = arith.constant 0 : index
      %78 = vector.load %arg10[%c0_38, %c0_39] : memref<8x1xf32, #tpu.memory_space<vmem>>, vector<8x1xf32>
      %79 = vector.shape_cast %78 : vector<8x1xf32> to vector<1x8x1xf32>
      %cst_40 = arith.constant dense<0.000000e+00> : vector<1xf32>
      %80 = vector.multi_reduction <add>, %79, %cst_40 [1, 2] : vector<1x8x1xf32> to vector<1xf32>
      %81 = vector.shape_cast %80 : vector<1xf32> to vector<1x1x1xf32>
      %82 = vector.extract %81[0, 0, 0] : f32 from vector<1x1x1xf32>
      %83 = tpu.iota {dimensions = array<i32: 2>} : vector<1x1x128xi32>
      %c0_i32_41 = arith.constant 0 : i32
      %84 = vector.broadcast %c0_i32_41 : i32 to vector<1x1x128xi32>
      %85 = arith.cmpi eq, %83, %84 : vector<1x1x128xi32>
      %c1_i32_42 = arith.constant 1 : i32
      %86 = vector.broadcast %c1_i32_42 : i32 to vector<1x1x128xi32>
      %87 = arith.cmpi eq, %83, %86 : vector<1x1x128xi32>
      %cst_43 = arith.constant 0.000000e+00 : f32
      %88 = vector.broadcast %82 : f32 to vector<1x1x128xf32>
      %89 = vector.broadcast %cst_43 : f32 to vector<1x1x128xf32>
      %90 = arith.select %87, %88, %89 : vector<1x1x128xi1>, vector<1x1x128xf32>
      %91 = vector.broadcast %77 : f32 to vector<1x1x128xf32>
      %92 = arith.select %85, %91, %90 : vector<1x1x128xi1>, vector<1x1x128xf32>
      %c0_44 = arith.constant 0 : index
      %c0_45 = arith.constant 0 : index
      %c0_46 = arith.constant 0 : index
      %93 = vector.load %arg8[%c0_44, %c0_45, %c0_46] : memref<1x1x128xf32, #tpu.memory_space<vmem>>, vector<1x1x128xf32>
      tpu.vector_store %arg8[%c0_44, %c0_45, %c0_46], %92 {strides = array<i32>} : memref<1x1x128xf32, #tpu.memory_space<vmem>>, vector<1x1x128xf32>,
    } else {
    }
    return
  }
  func.func @transform_0(%arg0: i32, %arg1: i32) -> (i32, i32) {
    %c1_i32 = arith.constant 1 : i32
    %0 = arith.muli %arg0, %c1_i32 : i32
    %1 = arith.addi %0, %arg1 : i32
    %c0_i32 = arith.constant 0 : i32
    %2 = arith.minsi %1, %c0_i32 : i32
    %c0_i32_0 = arith.constant 0 : i32
    %c0_i32_1 = arith.constant 0 : i32
    return %2, %c0_i32_0 : i32, i32
  }
  func.func @transform_1(%arg0: i32, %arg1: i32) -> (i32, i32) {
    %c1_i32 = arith.constant 1 : i32
    %0 = arith.muli %arg0, %c1_i32 : i32
    %1 = arith.addi %0, %arg1 : i32
    %c0_i32 = arith.constant 0 : i32
    %2 = arith.minsi %1, %c0_i32 : i32
    %c0_i32_0 = arith.constant 0 : i32
    %c0_i32_1 = arith.constant 0 : i32
    return %2, %c0_i32_0 : i32, i32
  }
  func.func @transform_2(%arg0: i32, %arg1: i32) -> (i32, i32) {
    %c1_i32 = arith.constant 1 : i32
    %0 = arith.muli %arg0, %c1_i32 : i32
    %1 = arith.addi %0, %arg1 : i32
    %c0_i32 = arith.constant 0 : i32
    %2 = arith.minsi %1, %c0_i32 : i32
    %c0_i32_0 = arith.constant 0 : i32
    %c0_i32_1 = arith.constant 0 : i32
    return %2, %c0_i32_0 : i32, i32
  }
  func.func @transform_3(%arg0: i32, %arg1: i32) -> (i32, i32) {
    %c1_i32 = arith.constant 1 : i32
    %0 = arith.muli %arg0, %c1_i32 : i32
    %1 = arith.addi %0, %arg1 : i32
    %c0_i32 = arith.constant 0 : i32
    %2 = arith.minsi %1, %c0_i32 : i32
    %c0_i32_0 = arith.constant 0 : i32
    %c0_i32_1 = arith.constant 0 : i32
    return %2, %c0_i32_0 : i32, i32
  }
  func.func @transform_4(%arg0: i32, %arg1: i32) -> (i32, i32) {
    %c0_i32 = arith.constant 0 : i32
    %c0_i32_0 = arith.constant 0 : i32
    %c0_i32_1 = arith.constant 0 : i32
    return %c0_i32, %c0_i32_0 : i32, i32
  }
  func.func @transform_5(%arg0: i32, %arg1: i32) -> (i32, i32) {
    %c0_i32 = arith.constant 0 : i32
    %c0_i32_0 = arith.constant 0 : i32
    %c0_i32_1 = arith.constant 0 : i32
    return %c0_i32, %c0_i32_0 : i32, i32
  }
  func.func @transform_6(%arg0: i32, %arg1: i32) -> (i32, i32, i32) {
    %c0_i32 = arith.constant 0 : i32
    %c0_i32_0 = arith.constant 0 : i32
    %c0_i32_1 = arith.constant 0 : i32
    return %arg0, %c0_i32, %c0_i32_0 : i32, i32, i32
  }
}

</mosaic_0001>

<bundles_post_ra>
// kernel: jigen_loss.1
= control target key start
LH: loop header
LB: loop body
LE: loop exit
PB: predicated region body
PF: predicated region fallthrough
CT: control target
= control target key end

     0   :  { %11 = vsyncpa [#allocation5], 0  ;;  %s376_s24 = smov [#allocation4]   ;;  %s377_s26 = smov 128   ;;  %s460_s0 = inlined_call_operand.vmem [shape: f32[8,16], index: 0, kind: input, shape index: {}]   ;;  %s461_s1 = inlined_call_operand.vmem [shape: s32[8,1], index: 1, kind: input, shape index: {}]   ;;  %s462_s2 = inlined_call_operand.vmem [shape: f32[8,32], index: 2, kind: input, shape index: {}]   ;;  %s463_s3 = inlined_call_operand.vmem [shape: s32[8,1], index: 3, kind: input, shape index: {}]   ;;  %s464_s4 = inlined_call_operand.hbm [shape: f32[31,32], index: 4, kind: input, shape index: {}]   ;;  %s465_s5 = inlined_call_operand.vmem [shape: f32[1,31], index: 5, kind: input, shape index: {}]   ;;  %s466_s6 = inlined_call_operand.vmem [shape: f32[1,1,128], index: 6, kind: output, shape index: {}]  }
   0x1   :  { %s64_s23 = sshll.u32 %s464_s4, 4  ;;  %s66_s25 = sshll.u32 %s376_s24, 4  ;;  %s65_s23 = int_to_ptr.hbm [resolvable:$true] %s64_s23  ;;  %s67_s25 = int_to_ptr.vmem [resolvable:$true] %s66_s25 }
   0x2   :  { %s378_s27 = smov 8  }
   0x3   :  { %72 = dma.hbm_to_vmem [thread:$0]  %s65_s23, 512, %s67_s25, [#allocation5], %s377_s26, %s377_s26, %s378_s27  }
   0x4   :  { %374 = dma.done.wait [#allocation5], 512  }
   0x5   :  { %375 = vsyncadd [#allocation5], 4294966784  ;;  %v379_v0 = vmov 0   ;;  %vm201_vm0 = vcmask 261120   ;;  %vm164_vm1 = vcmask 130048   ;;  %v161_v2 = vld [vmem:[%s460_s0] sm:$0xff]  ;;  %v177_v16 = vlaneseq }
   0x6   :  { %339 = vset.pattern.permute.xlu1 %v379_v0  ;;  %340 = vset.pattern.permute.xlu0 %v379_v0  ;;  %v196_v1 = vld [vmem:[#allocation4 + $0x18] sm:$0x7f]  ;;  %v165_v3 = vsel %vm164_vm1, %v161_v2, -inf  ;;  %v195_v4 = vld [vmem:[#allocation4 + $0x10] sm:$0xff]  ;;  %v194_v6 = vld [vmem:[#allocation4 + $0x8] sm:$0xff]  ;;  %vm239_vm3 = vcmask 252928  }
   0x7   :  { %325 = vmatpush.xpose.msk.msra.mxu0 %vm201_vm0, %v196_v1  ;;  %166 = vmax.xlane.f32.xlu0 %v165_v3  ;;  %v162_v5 = vld [vmem:[%s461_s1] sm:$0xff]  ;;  %v193_v8 = vld [vmem:[#allocation4] sm:$0xff]  ;;  %v438_v17 = vand.u32 127, %v177_v16  ;;  %vm152_vm5 = vcmask 7168   ;;  %v380_v27 = vmov 0.0  }
   0x8   :  { %180 = vperm.xlu1 %339, %v162_v5   ;;  %v238_v7 = vld [vmem:[%s463_s3] sm:$0xff]  ;;  %153 = vst.msk [vmem:[#allocation2] sm:$0xff] %vm152_vm5, %v380_v27 }
   0x9   :  { %v192_v9 = vld [vmem:[%s462_s2] sm:$0xff]  ;;  %154 = vst.msk [vmem:[#allocation3] sm:$0xff] %vm152_vm5, %v380_v27  ;;  %vm290_vm6 = vcmp.eq.s32.totalorder %v438_v17, 1  ;;  %vm289_vm7 = vcmp.eq.s32.totalorder %v438_v17, 0 }
   0xa   :  { %v341_v18 = vld [vmem:[%s465_s5] ss:$0 sm:$0xff] }
   0xb   :  { %326 = vmatpush.xpose.msk.msra.mxu0 %vm201_vm0, %v195_v4 }
   0xf   :  { %327 = vmatpush.xpose.msk.msra.mxu0 %vm201_vm0, %v194_v6  ;;  %v160_v36 = vld [vmem:[#allocation2] sm:$0xff] }
  0x10   :  { %253 = vperm.xlu1 %339, %v238_v7   ;;  %v237_v50 = vld [vmem:[#allocation3] sm:$0xff] }
  0x13   :  { %328 = vmatpush.xpose.msk.msra.mxu0 %vm201_vm0, %v193_v8 }
  0x16   :  { %329 = vmatmul.msk.f32.vlgmr.msra.gmra.mxu0 %vm201_vm0, %v192_v9 }
  0x7a   :  { %v167_v10 = vpop.xlane.xlu0 %166  ;;  %v181_v14 = vpop.permute.xlu1 %180 }
  0x7b   :  { %v168_v11 = vsub.f32 %v161_v2, %v167_v10  ;;  %vm182_vm4 = vcmp.eq.s32.totalorder %v438_v17, %v181_v14 }
  0x7c   :  { %v183_v25 = vsel %vm182_vm4, %v161_v2, 0.0 }
  0x7d   :  { %v169_v12 = vmul.f32 1.442695, %v168_v11  ;;  %v184_v26 = vsel %vm164_vm1, %v183_v25, 0.0 }
  0x7f   :  { %342 = vpow2.f32 %v169_v12 }
  0x82   :  { %v254_v19 = vpop.permute.xlu1 %253 }
  0x83   :  { %vm255_vm2 = vcmp.eq.s32.totalorder %v438_v17, %v254_v19 }
  0x85   :  { %v343_v13 = vpop.eup %342 }
  0x86   :  { %v171_v15 = vsel %vm164_vm1, %v343_v13, 0.0 }
  0x87   :  { %172 = vadd.xlane.f32.xlu2 %v171_v15 }
  0x93   :  { %v234_v20 = vpop.f32.mrf.mxu0 }
  0x94   :  { %v235_v21 = vadd.f32 %v341_v18, %v234_v20 }
  0x96   :  { %v240_v22 = vsel %vm239_vm3, %v235_v21, -inf  ;;  %v256_v23 = vsel %vm255_vm2, %v235_v21, 0.0 }
  0x97   :  { %241 = vmax.xlane.f32.xlu0 %v240_v22  ;;  %v257_v24 = vsel %vm239_vm3, %v256_v23, 0.0 }
  0x98   :  { %258 = vadd.xlane.f32.xlu1 %v257_v24 }
  0x9f   :  { %185 = vadd.xlane.f32.xlu0 %v184_v26 }
  0xfa   :  { %v173_v28 = vpop.xlane.xlu2 %172 }
  0xfb   :  { %344 = vlog2.f32 %v173_v28 }
 0x101   :  { %v345_v29 = vpop.eup %344 }
 0x102   :  { %v175_v32 = vmul.f32 0.6931472, %v345_v29 }
 0x104   :  { %v176_v34 = vadd.f32 %v175_v32, %v167_v10 }
 0x10a   :  { %v242_v30 = vpop.xlane.xlu0 %241 }
 0x10b   :  { %v243_v31 = vsub.f32 %v235_v21, %v242_v30  ;;  %v259_v49 = vpop.xlane.xlu1 %258 }
 0x10d   :  { %v244_v33 = vmul.f32 1.442695, %v243_v31 }
 0x10f   :  { %346 = vpow2.f32 %v244_v33 }
 0x112   :  { %v186_v35 = vpop.xlane.xlu0 %185 }
 0x113   :  { %v187_v37 = vsub.f32 %v176_v34, %v186_v35 }
 0x115   :  { %v347_v38 = vpop.eup %346  ;;  %v189_v39 = vadd.f32 %v187_v37, %v160_v36 }
 0x116   :  { %v246_v40 = vsel %vm239_vm3, %v347_v38, 0.0 }
 0x117   :  { %191 = vst.msk [vmem:[#allocation2] sm:$0xff] %vm152_vm5, %v189_v39  ;;  %247 = vadd.xlane.f32.xlu2 %v246_v40 }
 0x11e   :  { %v267_v41 = vld [vmem:[#allocation2] sm:$0xff] }
 0x11f   :  { %v268_v42 = vsel %vm152_vm5, %v267_v41, 0.0 }
 0x120   :  { %269 = vadd.xlane.f32.xlu2 %v268_v42 }
 0x18a   :  { %v248_v43 = vpop.xlane.xlu2 %247 }
 0x18b   :  { %348 = vlog2.f32 %v248_v43 }
 0x191   :  { %v349_v44 = vpop.eup %348 }
 0x192   :  { %v250_v45 = vmul.f32 0.6931472, %v349_v44 }
 0x193   :  { %v270_v46 = vpop.xlane.xlu2 %269 }
 0x194   :  { %v251_v47 = vadd.f32 %v250_v45, %v242_v30  ;;  %v271_v48 = vrot.slane %v270_v46, 4 }
 0x196   :  { %v260_v51 = vsub.f32 %v251_v47, %v259_v49  ;;  %v272_v52 = vadd.f32 %v271_v48, %v270_v46 }
 0x198   :  { %v262_v53 = vadd.f32 %v260_v51, %v237_v50  ;;  %v273_v54 = vrot.slane %v272_v52, 2 }
 0x19a   :  { %263 = vst.msk [vmem:[#allocation3] sm:$0xff] %vm152_vm5, %v262_v53  ;;  %v274_v55 = vadd.f32 %v273_v54, %v272_v52 }
 0x19c   :  { %v275_v56 = vrot.slane %v274_v55, 1 }
 0x19e   :  { %v276_v57 = vadd.f32 %v275_v56, %v274_v55 }
 0x1a0   :  { %330 = vpush %v276_v57 }
 0x1a1   :  { %v278_v58 = vld [vmem:[#allocation3] sm:$0xff] }
 0x1a2   :  { %v279_v59 = vsel %vm152_vm5, %v278_v58, 0.0 }
 0x1a3   :  { %280 = vadd.xlane.f32.xlu0 %v279_v59 }
 0x1d1   :  { %s331_s2 = spop %330 }
 0x1d2   :  { %v293_v4 = vstv %s331_s2 }
 0x216   :  { %v281_v60 = vpop.xlane.xlu0 %280 }
 0x217   :  { %v282_v61 = vrot.slane %v281_v60, 4 }
 0x219   :  { %v283_v62 = vadd.f32 %v282_v61, %v281_v60 }
 0x21b   :  { %v284_v63 = vrot.slane %v283_v62, 2 }
 0x21d   :  { %v285_v0 = vadd.f32 %v284_v63, %v283_v62 }
 0x21f   :  { %v286_v1 = vrot.slane %v285_v0, 1 }
 0x221   :  { %v287_v2 = vadd.f32 %v286_v1, %v285_v0 }
 0x223   :  { %332 = vpush %v287_v2 }
 0x254   :  { %s333_s5 = spop %332 }
 0x255   :  { %v291_v3 = vstv %s333_s5 }
 0x256   :  { %v292_v5 = vsel %vm290_vm6, %v291_v3, 0.0 }
 0x257   :  { %v294_v6 = vsel %vm289_vm7, %v293_v4, %v292_v5 }
 0x258   :  { %295 = vst [vmem:[%s466_s6] sm:$0x1] %v294_v6 }
 0x259   :  { %300 = vsyncpa [#allocation5], 1 }

</bundles_post_ra>
